<compile_context>
chip_gen: v7x
topology: tpu7x:2x2x1
jax: 0.10.0
libtpu: 0.0.40
codegen_flags: <defaults>
</compile_context>

<pallas_src>
import jax
import jax.numpy as jnp
from jax.experimental import pallas as pl
from jax.experimental.pallas import tpu as pltpu

# ----------------------------- model hyper-params (small) ---------------------
VOCAB_SIZE = 30522      # 'BERT' tokenizer branch of the module
EMBED_SIZE = 32         # embed_size (== max_len, required by the module's math)
MAX_LEN = EMBED_SIZE
FILTER_NUM = 16
FILTER_SIZE = 5
LINEAR_SIZE = 8
NUM_CLASS = 4
BATCH = 2

CONV_LEN = MAX_LEN - FILTER_SIZE + 1       # L - k + 1 = 28
POOL_LEN = CONV_LEN // 2                   # MaxPool1d(kernel=2, stride=2) = 14
LINEAR_IN = FILTER_NUM * POOL_LEN          # F * Lp = 224


# ----------------------------- fused kernel ------------------------------------
def fused_kernel(x_ref, we_ref, wo_ref, cb_ref, w1_ref, b1_ref, w2_ref, b2_ref,
                 out_ref):
    """Conv1d + ReLU + MaxPool1d(2) + Linear1 + ReLU + Linear2, whole batch at once.

    x_ref  : (B, L*E)     bf16  flattened embeddings (row-major (l, e) order)
    we_ref : (L*E, F*Lp)  bf16  banded conv weight producing conv[:, f, 2p]
    wo_ref : (L*E, F*Lp)  bf16  banded conv weight producing conv[:, f, 2p+1]
    cb_ref : (1, F*Lp)    f32   conv bias, repeated per filter block (lane-dense)
    w1_ref : (F*Lp, H)    f32   Linear1 weight (transposed)
    b1_ref : (1, H)       f32
    w2_ref : (H, C)       f32   Linear2 weight (transposed)
    b2_ref : (1, C)       f32
    out    : (B, C)       f32
    """
    x = x_ref[...]

    # Conv1d at even / odd time steps, already in filter-major flat layout (B, F*Lp).
    conv_e = jnp.dot(x, we_ref[...], preferred_element_type=jnp.float32)
    conv_o = jnp.dot(x, wo_ref[...], preferred_element_type=jnp.float32)

    bias = cb_ref[...]
    conv_e = jnp.maximum(conv_e + bias, 0.0)          # ReLU
    conv_o = jnp.maximum(conv_o + bias, 0.0)          # ReLU
    flat = jnp.maximum(conv_e, conv_o)                # MaxPool1d(2)  -> (B, F*Lp)

    # MLP head.
    h = jnp.dot(flat, w1_ref[...], preferred_element_type=jnp.float32) + b1_ref[...]
    h = jnp.maximum(h, 0.0)
    out_ref[...] = (jnp.dot(h, w2_ref[...], preferred_element_type=jnp.float32)
                    + b2_ref[...])


def fused_forward(x_flat, w_even, w_odd, cb_row, w1t, b1_row, w2t, b2_row):
    b, d = x_flat.shape
    n = w_even.shape[1]
    hdim = w1t.shape[1]
    c = w2t.shape[1]
    return pl.pallas_call(
        fused_kernel,
        out_shape=jax.ShapeDtypeStruct((b, c), jnp.float32),
        grid=(1,),
        in_specs=[
            pl.BlockSpec((b, d), lambda i: (0, 0)),
            pl.BlockSpec((d, n), lambda i: (0, 0)),
            pl.BlockSpec((d, n), lambda i: (0, 0)),
            pl.BlockSpec((1, n), lambda i: (0, 0)),
            pl.BlockSpec((n, hdim), lambda i: (0, 0)),
            pl.BlockSpec((1, hdim), lambda i: (0, 0)),
            pl.BlockSpec((hdim, c), lambda i: (0, 0)),
            pl.BlockSpec((1, c), lambda i: (0, 0)),
        ],
        out_specs=pl.BlockSpec((b, c), lambda i: (0, 0)),
        compiler_params=pltpu.CompilerParams(dimension_semantics=("arbitrary",)),
    )(x_flat, w_even, w_odd, cb_row, w1t, b1_row, w2t, b2_row)


# ----------------------------- one-time parameter packing ----------------------
def prepare_params(params):
    """Pack PyTorch-layout weights into kernel layouts (run ONCE, not per forward).

    W_even[l*E + e, f*Lp + p] = conv_w[f, e, l - 2p]       if 0 <= l - 2p     < K
    W_odd [l*E + e, f*Lp + p] = conv_w[f, e, l - (2p+1)]   if 0 <= l - (2p+1) < K
    so that  x_flat @ W_even = conv[:, f, 2p]  and  x_flat @ W_odd = conv[:, f, 2p+1].
    """
    w = params["conv_w"].astype(jnp.float32)                     # (F, E, K)
    l = jnp.arange(MAX_LEN)[:, None, None]                       # (L, 1, 1)
    p = jnp.arange(POOL_LEN)[None, :, None]                      # (1, Lp, 1)
    k = jnp.arange(FILTER_SIZE)[None, None, :]                   # (1, 1, K)
    sel_even = (l == 2 * p + k).astype(jnp.float32)              # (L, Lp, K)
    sel_odd = (l == 2 * p + 1 + k).astype(jnp.float32)           # (L, Lp, K)

    def band(sel):
        w4 = jnp.einsum("lpk,fek->lefp", sel, w)                 # (L, E, F, Lp)
        return w4.reshape(MAX_LEN * EMBED_SIZE, FILTER_NUM * POOL_LEN)

    return {
        "embedding": params["embedding"],                        # (V, E) bf16
        "w_even": band(sel_even).astype(jnp.bfloat16),           # (L*E, F*Lp)
        "w_odd": band(sel_odd).astype(jnp.bfloat16),             # (L*E, F*Lp)
        "conv_b_row": jnp.repeat(params["conv_b"], POOL_LEN)[None, :].astype(jnp.float32),
        "w1t": params["w1"].T.astype(jnp.float32),               # (F*Lp, H)
        "b1_row": params["b1"].reshape(1, LINEAR_SIZE).astype(jnp.float32),
        "w2t": params["w2"].T.astype(jnp.float32),               # (H, C)
        "b2_row": params["b2"].reshape(1, NUM_CLASS).astype(jnp.float32),
    }


# ----------------------------- full forward -----------------------------------
@jax.jit
def classifier_cnn_forward(prepared, input_ids):
    # Embedding lookup (data-dependent gather) kept as plain-JAX glue.
    # TODO(synk): could move into the kernel via scalar-prefetched ids + DMA row gather.
    emb = prepared["embedding"][input_ids]                       # (B, L, E) bf16
    x_flat = emb.reshape(input_ids.shape[0], MAX_LEN * EMBED_SIZE)  # contiguous, free
    return fused_forward(
        x_flat,
        prepared["w_even"], prepared["w_odd"], prepared["conv_b_row"],
        prepared["w1t"], prepared["b1_row"], prepared["w2t"], prepared["b2_row"],
    )


# ----------------------------- pure-JAX reference ------------------------------
def reference_forward(params, input_ids):
    emb = params["embedding"][input_ids].astype(jnp.float32)     # (B, L, E)
    x = jnp.transpose(emb, (0, 2, 1))                            # (B, E, L)
    w = params["conv_w"].astype(jnp.float32)                     # (F, E, K)
    patches = jnp.stack([x[:, :, k:k + CONV_LEN] for k in range(FILTER_SIZE)],
                        axis=-1)                                 # (B, E, Lc, K)
    conv = jnp.einsum("beck,fek->bfc", patches, w) + params["conv_b"][None, :, None]
    conv = jnp.maximum(conv, 0.0)
    pooled = jnp.max(conv.reshape(conv.shape[0], FILTER_NUM, POOL_LEN, 2), axis=-1)
    flat = pooled.reshape(pooled.shape[0], -1)                   # filter-major
    h = jnp.maximum(flat @ params["w1"].T + params["b1"], 0.0)
    return h @ params["w2"].T + params["b2"]


# ----------------------------- deterministic params ----------------------------
def init_params(key):
    ks = jax.random.split(key, 6)
    return {
        # nn.Embedding default init: N(0, 1); stored bf16 (kernel & reference share it)
        "embedding": jax.random.normal(ks[0], (VOCAB_SIZE, EMBED_SIZE),
                                       jnp.float32).astype(jnp.bfloat16),
        # Conv1d(E -> F, k=5); stored bf16 (kernel & reference share rounded values)
        "conv_w": (0.05 * jax.random.normal(ks[1], (FILTER_NUM, EMBED_SIZE, FILTER_SIZE),
                                            jnp.float32)).astype(jnp.bfloat16),
        "conv_b": 0.05 * jax.random.normal(ks[2], (FILTER_NUM,), jnp.float32),
        # Linear(LINEAR_IN -> LINEAR_SIZE)
        "w1": 0.05 * jax.random.normal(ks[3], (LINEAR_SIZE, LINEAR_IN), jnp.float32),
        "b1": 0.05 * jax.random.normal(ks[4], (LINEAR_SIZE,), jnp.float32),
        # Linear(LINEAR_SIZE -> NUM_CLASS) with nn.init.normal_ (std=1)
        "w2": jax.random.normal(ks[5], (NUM_CLASS, LINEAR_SIZE), jnp.float32),
        "b2": jax.random.normal(jax.random.fold_in(ks[5], 1), (NUM_CLASS,), jnp.float32),
    }


if __name__ == "__main__":
    key = jax.random.PRNGKey(0)
    pkey, dkey = jax.random.split(key)
    params = init_params(pkey)
    prepared = prepare_params(params)   # one-time weight packing (outside the jit)

    input_ids = jax.random.randint(dkey, (BATCH, MAX_LEN), 0, VOCAB_SIZE, dtype=jnp.int32)

    out = classifier_cnn_forward(prepared, input_ids)
    out = jax.block_until_ready(out)
    assert out.shape == (BATCH, NUM_CLASS), out.shape

    ref = reference_forward(params, input_ids)
    assert jnp.allclose(out, ref, rtol=1e-3, atol=1e-3), (
        f"mismatch: max abs diff = {jnp.max(jnp.abs(out - ref))}")

    print("KERNEL_OK")
</pallas_src>

<mosaic_0001>
module attributes {stable_mosaic.version = 11 : i64} {
  func.func @fused_kernel(%arg0: i32, %arg1: memref<2x1024xbf16, #tpu.memory_space<vmem>>, %arg2: memref<1024x224xbf16, #tpu.memory_space<vmem>>, %arg3: memref<1024x224xbf16, #tpu.memory_space<vmem>>, %arg4: memref<1x224xf32, #tpu.memory_space<vmem>>, %arg5: memref<224x8xf32, #tpu.memory_space<vmem>>, %arg6: memref<1x8xf32, #tpu.memory_space<vmem>>, %arg7: memref<8x4xf32, #tpu.memory_space<vmem>>, %arg8: memref<1x4xf32, #tpu.memory_space<vmem>>, %arg9: memref<2x4xf32, #tpu.memory_space<vmem>>) attributes {dimension_semantics = [#tpu.dimension_semantics<arbitrary>], iteration_bounds = array<i64: 1>, scalar_prefetch = 0 : i64, scratch_operands = 0 : i64, tpu.core_type = #tpu.core_type<tc>, window_params = [{pipeline_mode = #tpu.pipeline_mode<synchronous>, transform_indices = @transform_0, window_bounds = array<i64: 2, 1024>}, {pipeline_mode = #tpu.pipeline_mode<synchronous>, transform_indices = @transform_1, window_bounds = array<i64: 1024, 224>}, {pipeline_mode = #tpu.pipeline_mode<synchronous>, transform_indices = @transform_2, window_bounds = array<i64: 1024, 224>}, {pipeline_mode = #tpu.pipeline_mode<synchronous>, transform_indices = @transform_3, window_bounds = array<i64: 1, 224>}, {pipeline_mode = #tpu.pipeline_mode<synchronous>, transform_indices = @transform_4, window_bounds = array<i64: 224, 8>}, {pipeline_mode = #tpu.pipeline_mode<synchronous>, transform_indices = @transform_5, window_bounds = array<i64: 1, 8>}, {pipeline_mode = #tpu.pipeline_mode<synchronous>, transform_indices = @transform_6, window_bounds = array<i64: 8, 4>}, {pipeline_mode = #tpu.pipeline_mode<synchronous>, transform_indices = @transform_7, window_bounds = array<i64: 1, 4>}, {pipeline_mode = #tpu.pipeline_mode<synchronous>, transform_indices = @transform_8, window_bounds = array<i64: 2, 4>}]} {
    %c0 = arith.constant 0 : index
    %c0_0 = arith.constant 0 : index
    %0 = vector.load %arg1[%c0, %c0_0] : memref<2x1024xbf16, #tpu.memory_space<vmem>>, vector<2x1024xbf16>
    %c0_1 = arith.constant 0 : index
    %c0_2 = arith.constant 0 : index
    %1 = vector.load %arg2[%c0_1, %c0_2] : memref<1024x224xbf16, #tpu.memory_space<vmem>>, vector<1024x224xbf16>
    %cst = arith.constant dense<0.000000e+00> : vector<2x224xf32>
    %2 = tpu.matmul %0, %1, %cst {dimension_numbers = #tpu.dot_dimension_numbers<[1], [0], [0], [1], [0, 0, 1, 1], [], []>} : vector<2x1024xbf16>, vector<1024x224xbf16>, vector<2x224xf32> -> vector<2x224xf32>
    %c0_3 = arith.constant 0 : index
    %c0_4 = arith.constant 0 : index
    %3 = vector.load %arg3[%c0_3, %c0_4] : memref<1024x224xbf16, #tpu.memory_space<vmem>>, vector<1024x224xbf16>
    %cst_5 = arith.constant dense<0.000000e+00> : vector<2x224xf32>
    %4 = tpu.matmul %0, %3, %cst_5 {dimension_numbers = #tpu.dot_dimension_numbers<[1], [0], [0], [1], [0, 0, 1, 1], [], []>} : vector<2x1024xbf16>, vector<1024x224xbf16>, vector<2x224xf32> -> vector<2x224xf32>
    %c0_6 = arith.constant 0 : index
    %c0_7 = arith.constant 0 : index
    %5 = vector.load %arg4[%c0_6, %c0_7] : memref<1x224xf32, #tpu.memory_space<vmem>>, vector<1x224xf32>
    %6 = vector.broadcast %5 : vector<1x224xf32> to vector<2x224xf32>
    %7 = arith.addf %2, %6 : vector<2x224xf32>
    %cst_8 = arith.constant 0.000000e+00 : f32
    %8 = vector.broadcast %cst_8 : f32 to vector<2x224xf32>
    %9 = arith.maximumf %7, %8 : vector<2x224xf32>
    %10 = vector.broadcast %5 : vector<1x224xf32> to vector<2x224xf32>
    %11 = arith.addf %4, %10 : vector<2x224xf32>
    %cst_9 = arith.constant 0.000000e+00 : f32
    %12 = vector.broadcast %cst_9 : f32 to vector<2x224xf32>
    %13 = arith.maximumf %11, %12 : vector<2x224xf32>
    %14 = arith.maximumf %9, %13 : vector<2x224xf32>
    %c0_10 = arith.constant 0 : index
    %c0_11 = arith.constant 0 : index
    %15 = vector.load %arg5[%c0_10, %c0_11] : memref<224x8xf32, #tpu.memory_space<vmem>>, vector<224x8xf32>
    %cst_12 = arith.constant dense<0.000000e+00> : vector<2x8xf32>
    %16 = tpu.matmul %14, %15, %cst_12 {dimension_numbers = #tpu.dot_dimension_numbers<[1], [0], [0], [1], [0, 0, 1, 1], [], []>} : vector<2x224xf32>, vector<224x8xf32>, vector<2x8xf32> -> vector<2x8xf32>
    %c0_13 = arith.constant 0 : index
    %c0_14 = arith.constant 0 : index
    %17 = vector.load %arg6[%c0_13, %c0_14] : memref<1x8xf32, #tpu.memory_space<vmem>>, vector<1x8xf32>
    %18 = vector.broadcast %17 : vector<1x8xf32> to vector<2x8xf32>
    %19 = arith.addf %16, %18 : vector<2x8xf32>
    %cst_15 = arith.constant 0.000000e+00 : f32
    %20 = vector.broadcast %cst_15 : f32 to vector<2x8xf32>
    %21 = arith.maximumf %19, %20 : vector<2x8xf32>
    %c0_16 = arith.constant 0 : index
    %c0_17 = arith.constant 0 : index
    %22 = vector.load %arg7[%c0_16, %c0_17] : memref<8x4xf32, #tpu.memory_space<vmem>>, vector<8x4xf32>
    %cst_18 = arith.constant dense<0.000000e+00> : vector<2x4xf32>
    %23 = tpu.matmul %21, %22, %cst_18 {dimension_numbers = #tpu.dot_dimension_numbers<[1], [0], [0], [1], [0, 0, 1, 1], [], []>} : vector<2x8xf32>, vector<8x4xf32>, vector<2x4xf32> -> vector<2x4xf32>
    %c0_19 = arith.constant 0 : index
    %c0_20 = arith.constant 0 : index
    %24 = vector.load %arg8[%c0_19, %c0_20] : memref<1x4xf32, #tpu.memory_space<vmem>>, vector<1x4xf32>
    %25 = vector.broadcast %24 : vector<1x4xf32> to vector<2x4xf32>
    %26 = arith.addf %23, %25 : vector<2x4xf32>
    %c0_21 = arith.constant 0 : index
    %c0_22 = arith.constant 0 : index
    %27 = vector.load %arg9[%c0_21, %c0_22] : memref<2x4xf32, #tpu.memory_space<vmem>>, vector<2x4xf32>
    tpu.vector_store %arg9[%c0_21, %c0_22], %26 {strides = array<i32>} : memref<2x4xf32, #tpu.memory_space<vmem>>, vector<2x4xf32>,
    return
  }
  func.func @transform_0(%arg0: i32) -> (i32, i32) {
    %c0_i32 = arith.constant 0 : i32
    %c0_i32_0 = arith.constant 0 : i32
    %c0_i32_1 = arith.constant 0 : i32
    return %c0_i32, %c0_i32_0 : i32, i32
  }
  func.func @transform_1(%arg0: i32) -> (i32, i32) {
    %c0_i32 = arith.constant 0 : i32
    %c0_i32_0 = arith.constant 0 : i32
    %c0_i32_1 = arith.constant 0 : i32
    return %c0_i32, %c0_i32_0 : i32, i32
  }
  func.func @transform_2(%arg0: i32) -> (i32, i32) {
    %c0_i32 = arith.constant 0 : i32
    %c0_i32_0 = arith.constant 0 : i32
    %c0_i32_1 = arith.constant 0 : i32
    return %c0_i32, %c0_i32_0 : i32, i32
  }
  func.func @transform_3(%arg0: i32) -> (i32, i32) {
    %c0_i32 = arith.constant 0 : i32
    %c0_i32_0 = arith.constant 0 : i32
    %c0_i32_1 = arith.constant 0 : i32
    return %c0_i32, %c0_i32_0 : i32, i32
  }
  func.func @transform_4(%arg0: i32) -> (i32, i32) {
    %c0_i32 = arith.constant 0 : i32
    %c0_i32_0 = arith.constant 0 : i32
    %c0_i32_1 = arith.constant 0 : i32
    return %c0_i32, %c0_i32_0 : i32, i32
  }
  func.func @transform_5(%arg0: i32) -> (i32, i32) {
    %c0_i32 = arith.constant 0 : i32
    %c0_i32_0 = arith.constant 0 : i32
    %c0_i32_1 = arith.constant 0 : i32
    return %c0_i32, %c0_i32_0 : i32, i32
  }
  func.func @transform_6(%arg0: i32) -> (i32, i32) {
    %c0_i32 = arith.constant 0 : i32
    %c0_i32_0 = arith.constant 0 : i32
    %c0_i32_1 = arith.constant 0 : i32
    return %c0_i32, %c0_i32_0 : i32, i32
  }
  func.func @transform_7(%arg0: i32) -> (i32, i32) {
    %c0_i32 = arith.constant 0 : i32
    %c0_i32_0 = arith.constant 0 : i32
    %c0_i32_1 = arith.constant 0 : i32
    return %c0_i32, %c0_i32_0 : i32, i32
  }
  func.func @transform_8(%arg0: i32) -> (i32, i32) {
    %c0_i32 = arith.constant 0 : i32
    %c0_i32_0 = arith.constant 0 : i32
    %c0_i32_1 = arith.constant 0 : i32
    return %c0_i32, %c0_i32_0 : i32, i32
  }
}

</mosaic_0001>

<bundles_post_ra>
// kernel: classifier_cnn_forward.1
= control target key start
LH: loop header
LB: loop body
LE: loop exit
PB: predicated region body
PF: predicated region fallthrough
CT: control target
= control target key end

     0   :  { %v289_v36 = vlaneseq  ;;  %v2930_v37 = vmov 1966171168   ;;  %s3904_s0 = inlined_call_operand.vmem [shape: bf16[2,1024], index: 0, kind: input, shape index: {}]   ;;  %s3905_s1 = inlined_call_operand.vmem [shape: bf16[1024,224], index: 1, kind: input, shape index: {}]   ;;  %s3906_s2 = inlined_call_operand.vmem [shape: bf16[1024,224], index: 2, kind: input, shape index: {}]   ;;  %s3907_s3 = inlined_call_operand.vmem [shape: f32[1,224], index: 3, kind: input, shape index: {}]   ;;  %s3908_s4 = inlined_call_operand.vmem [shape: f32[224,8], index: 4, kind: input, shape index: {}]   ;;  %s3909_s5 = inlined_call_operand.vmem [shape: f32[1,8], index: 5, kind: input, shape index: {}]   ;;  %s3910_s6 = inlined_call_operand.vmem [shape: f32[8,4], index: 6, kind: input, shape index: {}]   ;;  %s3911_s7 = inlined_call_operand.vmem [shape: f32[1,4], index: 7, kind: input, shape index: {}]   ;;  %s3912_s8 = inlined_call_operand.hbm [shape: f32[2,4], index: 8, kind: output, shape index: {}]  }
   0x1   :  { %v2521_v0 = vld [vmem:[%s3905_s1 + $0x4] ss:$8 sps:$4 sm:$0xff]   ;;  %v2525_v2 = vld [vmem:[%s3905_s1] ss:$8 sps:$4 sm:$0xff]   ;;  %v2527_v4 = vld [vmem:[%s3905_s1 + $0x14] ss:$8 sps:$4 sm:$0xff]   ;;  %v302_v38 = vunpack.c.l.s4 %v2930_v37 }
   0x2   :  { %v2523_v1 = vld [vmem:[%s3906_s2 + $0x4] ss:$8 sps:$4 sm:$0xff]   ;;  %997 = vmatprep.subr.bf16.mxu0 %v2521_v0  ;;  %v2526_v3 = vld [vmem:[%s3906_s2] ss:$8 sps:$4 sm:$0xff]   ;;  %v2529_v5 = vld [vmem:[%s3906_s2 + $0x14] ss:$8 sps:$4 sm:$0xff]  }
   0x3   :  { %1803 = vmatprep.subr.bf16.mxu1 %v2523_v1  ;;  %998 = vmatpush1.bf16.msra.mxu0 %v2525_v2  ;;  %v2531_v6 = vld [vmem:[%s3905_s1 + $0x10] ss:$8 sps:$4 sm:$0xff]   ;;  %v2533_v8 = vld [vmem:[%s3905_s1 + $0x24] ss:$8 sps:$4 sm:$0xff]   ;;  %v2537_v10 = vld [vmem:[%s3905_s1 + $0x20] ss:$8 sps:$4 sm:$0xff]   ;;  %v303_v43 = vunpack.c.0.s8 %v302_v38 }
   0x4   :  { %1804 = vmatpush1.bf16.msra.mxu1 %v2526_v3  ;;  %999 = vmatprep.subr.bf16.mxu0 %v2527_v4  ;;  %v2532_v7 = vld [vmem:[%s3906_s2 + $0x10] ss:$8 sps:$4 sm:$0xff]   ;;  %v2535_v9 = vld [vmem:[%s3906_s2 + $0x24] ss:$8 sps:$4 sm:$0xff]   ;;  %v2538_v11 = vld [vmem:[%s3906_s2 + $0x20] ss:$8 sps:$4 sm:$0xff]  }
   0x5   :  { %1805 = vmatprep.subr.bf16.mxu1 %v2529_v5  ;;  %v2539_v12 = vld [vmem:[%s3905_s1 + $0x34] ss:$8 sps:$4 sm:$0xff]   ;;  %v2543_v14 = vld [vmem:[%s3905_s1 + $0x30] ss:$8 sps:$4 sm:$0xff]   ;;  %v2545_v16 = vld [vmem:[%s3905_s1 + $0x44] ss:$8 sps:$4 sm:$0xff]  }
   0x6   :  { %v2541_v13 = vld [vmem:[%s3906_s2 + $0x34] ss:$8 sps:$4 sm:$0xff]   ;;  %v2544_v15 = vld [vmem:[%s3906_s2 + $0x30] ss:$8 sps:$4 sm:$0xff]   ;;  %v2547_v17 = vld [vmem:[%s3906_s2 + $0x44] ss:$8 sps:$4 sm:$0xff]  }
   0x7   :  { %1000 = vmatpush1.bf16.msra.mxu0 %v2531_v6  ;;  %v2549_v18 = vld [vmem:[%s3905_s1 + $0x40] ss:$8 sps:$4 sm:$0xff]   ;;  %v2551_v20 = vld [vmem:[%s3905_s1 + $0x54] ss:$8 sps:$4 sm:$0xff]   ;;  %v2555_v22 = vld [vmem:[%s3905_s1 + $0x50] ss:$8 sps:$4 sm:$0xff]  }
   0x8   :  { %1806 = vmatpush1.bf16.msra.mxu1 %v2532_v7  ;;  %1001 = vmatprep.subr.bf16.mxu0 %v2533_v8  ;;  %v2550_v19 = vld [vmem:[%s3906_s2 + $0x40] ss:$8 sps:$4 sm:$0xff]   ;;  %v2553_v21 = vld [vmem:[%s3906_s2 + $0x54] ss:$8 sps:$4 sm:$0xff]   ;;  %v2556_v23 = vld [vmem:[%s3906_s2 + $0x50] ss:$8 sps:$4 sm:$0xff]  }
   0x9   :  { %1807 = vmatprep.subr.bf16.mxu1 %v2535_v9  ;;  %v2557_v24 = vld [vmem:[%s3905_s1 + $0x64] ss:$8 sps:$4 sm:$0xff]   ;;  %v2561_v26 = vld [vmem:[%s3905_s1 + $0x60] ss:$8 sps:$4 sm:$0xff]   ;;  %v2563_v28 = vld [vmem:[%s3905_s1 + $0x74] ss:$8 sps:$4 sm:$0xff]  }
   0xa   :  { %v2559_v25 = vld [vmem:[%s3906_s2 + $0x64] ss:$8 sps:$4 sm:$0xff]   ;;  %v2562_v27 = vld [vmem:[%s3906_s2 + $0x60] ss:$8 sps:$4 sm:$0xff]   ;;  %v2565_v29 = vld [vmem:[%s3906_s2 + $0x74] ss:$8 sps:$4 sm:$0xff]  }
   0xb   :  { %1002 = vmatpush1.bf16.msra.mxu0 %v2537_v10  ;;  %v2567_v30 = vld [vmem:[%s3905_s1 + $0x70] ss:$8 sps:$4 sm:$0xff]   ;;  %v2569_v32 = vld [vmem:[%s3905_s1 + $0x84] ss:$8 sps:$4 sm:$0xff]   ;;  %v2573_v34 = vld [vmem:[%s3905_s1 + $0x80] ss:$8 sps:$4 sm:$0xff]  }
   0xc   :  { %1808 = vmatpush1.bf16.msra.mxu1 %v2538_v11  ;;  %1003 = vmatprep.subr.bf16.mxu0 %v2539_v12  ;;  %v2568_v31 = vld [vmem:[%s3906_s2 + $0x70] ss:$8 sps:$4 sm:$0xff]   ;;  %v2571_v33 = vld [vmem:[%s3906_s2 + $0x84] ss:$8 sps:$4 sm:$0xff]   ;;  %v2574_v35 = vld [vmem:[%s3906_s2 + $0x80] ss:$8 sps:$4 sm:$0xff]  }
   0xd   :  { %1809 = vmatprep.subr.bf16.mxu1 %v2541_v13  ;;  %v2575_v39 = vld [vmem:[%s3905_s1 + $0x94] ss:$8 sps:$4 sm:$0xff]   ;;  %v2579_v41 = vld [vmem:[%s3905_s1 + $0x90] ss:$8 sps:$4 sm:$0xff]   ;;  %v3097_v42 = vshrl.u32 %v289_v36, 7  ;;  %v30_v52 = vld [vmem:[%s3904_s0] sm:$0xff] }
   0xe   :  { %v2577_v40 = vld [vmem:[%s3906_s2 + $0x94] ss:$8 sps:$4 sm:$0xff]   ;;  %v2580_v44 = vld [vmem:[%s3906_s2 + $0x90] ss:$8 sps:$4 sm:$0xff]   ;;  %v2581_v45 = vld [vmem:[%s3905_s1 + $0xa4] ss:$8 sps:$4 sm:$0xff]   ;;  %v300_v9 = vcombine.high %v30_v52, %v30_v52 }
   0xf   :  { %1004 = vmatpush1.bf16.msra.mxu0 %v2543_v14  ;;  %v2583_v46 = vld [vmem:[%s3906_s2 + $0xa4] ss:$8 sps:$4 sm:$0xff]   ;;  %v2585_v47 = vld [vmem:[%s3905_s1 + $0xa0] ss:$8 sps:$4 sm:$0xff]   ;;  %v3115_v49 = vsub.s32 %v303_v43, %v3097_v42  ;;  %v2587_v50 = vld [vmem:[%s3905_s1 + $0xb4] ss:$8 sps:$4 sm:$0xff]  }
  0x10   :  { %1810 = vmatpush1.bf16.msra.mxu1 %v2544_v15  ;;  %1005 = vmatprep.subr.bf16.mxu0 %v2545_v16  ;;  %v2586_v48 = vld [vmem:[%s3906_s2 + $0xa0] ss:$8 sps:$4 sm:$0xff]   ;;  %v2589_v51 = vld [vmem:[%s3906_s2 + $0xb4] ss:$8 sps:$4 sm:$0xff]   ;;  %v2591_v53 = vld [vmem:[%s3905_s1 + $0xb0] ss:$8 sps:$4 sm:$0xff]  }
  0x11   :  { %1811 = vmatprep.subr.bf16.mxu1 %v2547_v17  ;;  %v307_v54 = vrot.slane %v30_v52, %v3115_v49  ;;  %v2592_v55 = vld [vmem:[%s3906_s2 + $0xb0] ss:$8 sps:$4 sm:$0xff]   ;;  %v2593_v56 = vld [vmem:[%s3905_s1 + $0xc4] ss:$8 sps:$4 sm:$0xff]   ;;  %v2597_v59 = vld [vmem:[%s3905_s1 + $0xc0] ss:$8 sps:$4 sm:$0xff]   ;;  %v314_v13 = vrot.slane %v300_v9, %v3115_v49 }
  0x12   :  { %v2595_v57 = vld [vmem:[%s3906_s2 + $0xc4] ss:$8 sps:$4 sm:$0xff]   ;;  %v2598_v61 = vld [vmem:[%s3906_s2 + $0xc0] ss:$8 sps:$4 sm:$0xff]   ;;  %v2599_v62 = vld [vmem:[%s3905_s1 + $0xd4] ss:$8 sps:$4 sm:$0xff]  }
  0x13   :  { %1006 = vmatpush1.bf16.msra.mxu0 %v2549_v18  ;;  %v315_v58 = vcombine.high %v307_v54, %v307_v54  ;;  %v2601_v63 = vld [vmem:[%s3906_s2 + $0xd4] ss:$8 sps:$4 sm:$0xff]   ;;  %v2603_v0 = vld [vmem:[%s3905_s1 + $0xd0] ss:$8 sps:$4 sm:$0xff]   ;;  %v2605_v2 = vld [vmem:[%s3905_s1 + $0xe4] ss:$8 sps:$4 sm:$0xff]   ;;  %v3193_v15 = vrot.slane %v307_v54, %v3115_v49  ;;  %v316_v16 = vcombine.high %v314_v13, %v314_v13 }
  0x14   :  { %1812 = vmatpush1.bf16.msra.mxu1 %v2550_v19  ;;  %1007 = vmatprep.subr.bf16.mxu0 %v2551_v20  ;;  %v2604_v1 = vld [vmem:[%s3906_s2 + $0xd0] ss:$8 sps:$4 sm:$0xff]   ;;  %v2607_v3 = vld [vmem:[%s3906_s2 + $0xe4] ss:$8 sps:$4 sm:$0xff]   ;;  %v2609_v4 = vld [vmem:[%s3905_s1 + $0xe0] ss:$8 sps:$4 sm:$0xff]  }
  0x15   :  { %1813 = vmatprep.subr.bf16.mxu1 %v2553_v21  ;;  %v337_v60 = vrot.slane %v315_v58, %v3115_v49  ;;  %v2610_v5 = vld [vmem:[%s3906_s2 + $0xe0] ss:$8 sps:$4 sm:$0xff]   ;;  %v2611_v6 = vld [vmem:[%s3905_s1 + $0xf4] ss:$8 sps:$4 sm:$0xff]   ;;  %v2615_v8 = vld [vmem:[%s3905_s1 + $0xf0] ss:$8 sps:$4 sm:$0xff]   ;;  %v3205_v20 = vrot.slane %v316_v16, %v3115_v49  ;;  %v3208_v21 = vrot.slane %v314_v13, %v3115_v49 }
  0x16   :  { %v2613_v7 = vld [vmem:[%s3906_s2 + $0xf4] ss:$8 sps:$4 sm:$0xff]   ;;  %v2616_v10 = vld [vmem:[%s3906_s2 + $0xf0] ss:$8 sps:$4 sm:$0xff]   ;;  %v2619_v11 = vld [vmem:[%s3905_s1 + $0x104] ss:$8 sps:$4 sm:$0xff]  }
  0x17   :  { %1008 = vmatpush1.bf16.msra.mxu0 %v2555_v22  ;;  %1029 = vmatprep.mubr.bf16.mxu0 %v337_v60  ;;  %v2622_v12 = vld [vmem:[%s3906_s2 + $0x104] ss:$8 sps:$4 sm:$0xff]   ;;  %v2617_v14 = vld [vmem:[%s3905_s1 + $0x100] ss:$8 sps:$4 sm:$0xff]   ;;  %v2625_v18 = vld [vmem:[%s3905_s1 + $0x114] ss:$8 sps:$4 sm:$0xff]   ;;  %v347_v22 = vcombine.high %v337_v60, %v337_v60 }
  0x18   :  { %1814 = vmatpush1.bf16.msra.mxu1 %v2556_v23  ;;  %1009 = vmatprep.subr.bf16.mxu0 %v2557_v24  ;;  %v2620_v17 = vld [vmem:[%s3906_s2 + $0x100] ss:$8 sps:$4 sm:$0xff]   ;;  %v2628_v19 = vld [vmem:[%s3906_s2 + $0x114] ss:$8 sps:$4 sm:$0xff]   ;;  %v2623_v23 = vld [vmem:[%s3905_s1 + $0x110] ss:$8 sps:$4 sm:$0xff]  }
  0x19   :  { %1815 = vmatprep.subr.bf16.mxu1 %v2559_v25  ;;  %1835 = vmatprep.mubr.bf16.mxu1 %v337_v60  ;;  %v2626_v24 = vld [vmem:[%s3906_s2 + $0x110] ss:$8 sps:$4 sm:$0xff]   ;;  %v2631_v25 = vld [vmem:[%s3905_s1 + $0x124] ss:$8 sps:$4 sm:$0xff]   ;;  %v2644_v36 = vld [vmem:[%s3906_s2 + $0x140] ss:$8 sps:$4 sm:$0xff]  }
  0x1a   :  { %v2649_v37 = vld [vmem:[%s3905_s1 + $0x154] ss:$8 sps:$4 sm:$0xff]   ;;  %v2658_v43 = vld [vmem:[%s3906_s2 + $0x164] ss:$8 sps:$4 sm:$0xff]   ;;  %v2662_v49 = vld [vmem:[%s3906_s2 + $0x170] ss:$8 sps:$4 sm:$0xff]  }
  0x1b   :  { %1010 = vmatpush1.bf16.msra.mxu0 %v2561_v26  ;;  %v2634_v26 = vld [vmem:[%s3906_s2 + $0x124] ss:$8 sps:$4 sm:$0xff]   ;;  %v2652_v38 = vld [vmem:[%s3906_s2 + $0x154] ss:$8 sps:$4 sm:$0xff]   ;;  %v2665_v52 = vld [vmem:[%s3905_s1 + $0x180] ss:$8 sps:$4 sm:$0xff]  }
  0x1c   :  { %1816 = vmatpush1.bf16.msra.mxu1 %v2562_v27  ;;  %1011 = vmatprep.subr.bf16.mxu0 %v2563_v28  ;;  %v2629_v27 = vld [vmem:[%s3905_s1 + $0x120] ss:$8 sps:$4 sm:$0xff]   ;;  %v2673_v54 = vld [vmem:[%s3905_s1 + $0x194] ss:$8 sps:$4 sm:$0xff]   ;;  %v2679_v58 = vld [vmem:[%s3905_s1 + $0x1a4] ss:$8 sps:$4 sm:$0xff]  }
  0x1d   :  { %1817 = vmatprep.subr.bf16.mxu1 %v2565_v29  ;;  %v2632_v28 = vld [vmem:[%s3906_s2 + $0x120] ss:$8 sps:$4 sm:$0xff]   ;;  %v2637_v29 = vld [vmem:[%s3905_s1 + $0x134] ss:$8 sps:$4 sm:$0xff]   ;;  %v2698_v9 = vld [vmem:[%s3906_s2 + $0x1d0] ss:$8 sps:$4 sm:$0xff]  }
  0x1e   :  { %v2677_v60 = vld [vmem:[%s3905_s1 + $0x1a0] ss:$8 sps:$4 sm:$0xff]   ;;  %v2712_v16 = vld [vmem:[%s3906_s2 + $0x1f4] ss:$8 sps:$4 sm:$0xff]  }
  0x1f   :  { %1012 = vmatpush1.bf16.msra.mxu0 %v2567_v30  ;;  %v2640_v30 = vld [vmem:[%s3906_s2 + $0x134] ss:$8 sps:$4 sm:$0xff]   ;;  %v2704_v13 = vld [vmem:[%s3906_s2 + $0x1e0] ss:$8 sps:$4 sm:$0xff]  }
  0x20   :  { %1818 = vmatpush1.bf16.msra.mxu1 %v2568_v31  ;;  %1013 = vmatprep.subr.bf16.mxu0 %v2569_v32  ;;  %v2635_v31 = vld [vmem:[%s3905_s1 + $0x130] ss:$8 sps:$4 sm:$0xff]  }
  0x21   :  { %1819 = vmatprep.subr.bf16.mxu1 %v2571_v33  ;;  %v2638_v32 = vld [vmem:[%s3906_s2 + $0x130] ss:$8 sps:$4 sm:$0xff]   ;;  %v2643_v33 = vld [vmem:[%s3905_s1 + $0x144] ss:$8 sps:$4 sm:$0xff]  }
  0x23   :  { %1014 = vmatpush1.bf16.msra.mxu0 %v2573_v34  ;;  %v2646_v34 = vld [vmem:[%s3906_s2 + $0x144] ss:$8 sps:$4 sm:$0xff]  }
  0x24   :  { %1820 = vmatpush1.bf16.msra.mxu1 %v2574_v35  ;;  %1015 = vmatprep.subr.bf16.mxu0 %v2575_v39  ;;  %v2641_v35 = vld [vmem:[%s3905_s1 + $0x140] ss:$8 sps:$4 sm:$0xff]   ;;  %v2647_v39 = vld [vmem:[%s3905_s1 + $0x150] ss:$8 sps:$4 sm:$0xff]  }
  0x25   :  { %1821 = vmatprep.subr.bf16.mxu1 %v2577_v40  ;;  %v2650_v40 = vld [vmem:[%s3906_s2 + $0x150] ss:$8 sps:$4 sm:$0xff]  }
  0x27   :  { %1016 = vmatpush1.bf16.msra.mxu0 %v2579_v41  ;;  %v2655_v41 = vld [vmem:[%s3905_s1 + $0x164] ss:$8 sps:$4 sm:$0xff]  }
  0x28   :  { %1822 = vmatpush1.bf16.msra.mxu1 %v2580_v44  ;;  %1017 = vmatprep.subr.bf16.mxu0 %v2581_v45  ;;  %v2653_v44 = vld [vmem:[%s3905_s1 + $0x160] ss:$8 sps:$4 sm:$0xff]  }
  0x29   :  { %1823 = vmatprep.subr.bf16.mxu1 %v2583_v46  ;;  %v2656_v45 = vld [vmem:[%s3906_s2 + $0x160] ss:$8 sps:$4 sm:$0xff]   ;;  %v2661_v46 = vld [vmem:[%s3905_s1 + $0x174] ss:$8 sps:$4 sm:$0xff]  }
  0x2b   :  { %1018 = vmatpush1.bf16.msra.mxu0 %v2585_v47  ;;  %v2664_v47 = vld [vmem:[%s3906_s2 + $0x174] ss:$8 sps:$4 sm:$0xff]  }
  0x2c   :  { %1824 = vmatpush1.bf16.msra.mxu1 %v2586_v48  ;;  %1019 = vmatprep.subr.bf16.mxu0 %v2587_v50  ;;  %v2659_v48 = vld [vmem:[%s3905_s1 + $0x170] ss:$8 sps:$4 sm:$0xff]   ;;  %v2667_v50 = vld [vmem:[%s3905_s1 + $0x184] ss:$8 sps:$4 sm:$0xff]  }
  0x2d   :  { %1825 = vmatprep.subr.bf16.mxu1 %v2589_v51  ;;  %v2670_v51 = vld [vmem:[%s3906_s2 + $0x184] ss:$8 sps:$4 sm:$0xff]  }
  0x2f   :  { %1020 = vmatpush1.bf16.msra.mxu0 %v2591_v53  ;;  %v2668_v53 = vld [vmem:[%s3906_s2 + $0x180] ss:$8 sps:$4 sm:$0xff]  }
  0x30   :  { %1826 = vmatpush1.bf16.msra.mxu1 %v2592_v55  ;;  %1021 = vmatprep.subr.bf16.mxu0 %v2593_v56  ;;  %v2676_v55 = vld [vmem:[%s3906_s2 + $0x194] ss:$8 sps:$4 sm:$0xff]   ;;  %v2671_v56 = vld [vmem:[%s3905_s1 + $0x190] ss:$8 sps:$4 sm:$0xff]  }
  0x31   :  { %1827 = vmatprep.subr.bf16.mxu1 %v2595_v57  ;;  %v2674_v57 = vld [vmem:[%s3906_s2 + $0x190] ss:$8 sps:$4 sm:$0xff]  }
  0x33   :  { %1022 = vmatpush1.bf16.msra.mxu0 %v2597_v59  ;;  %v2682_v59 = vld [vmem:[%s3906_s2 + $0x1a4] ss:$8 sps:$4 sm:$0xff]  }
  0x34   :  { %1828 = vmatpush1.bf16.msra.mxu1 %v2598_v61  ;;  %1023 = vmatprep.subr.bf16.mxu0 %v2599_v62  ;;  %v2680_v61 = vld [vmem:[%s3906_s2 + $0x1a0] ss:$8 sps:$4 sm:$0xff]   ;;  %v2685_v62 = vld [vmem:[%s3905_s1 + $0x1b4] ss:$8 sps:$4 sm:$0xff]  }
  0x35   :  { %1829 = vmatprep.subr.bf16.mxu1 %v2601_v63  ;;  %v2688_v63 = vld [vmem:[%s3906_s2 + $0x1b4] ss:$8 sps:$4 sm:$0xff]  }
  0x37   :  { %1024 = vmatpush1.bf16.msra.mxu0 %v2603_v0  ;;  %v2683_v0 = vld [vmem:[%s3905_s1 + $0x1b0] ss:$8 sps:$4 sm:$0xff]  }
  0x38   :  { %1830 = vmatpush1.bf16.msra.mxu1 %v2604_v1  ;;  %1025 = vmatprep.subr.bf16.mxu0 %v2605_v2  ;;  %v2686_v1 = vld [vmem:[%s3906_s2 + $0x1b0] ss:$8 sps:$4 sm:$0xff]   ;;  %v2691_v2 = vld [vmem:[%s3905_s1 + $0x1c4] ss:$8 sps:$4 sm:$0xff]  }
  0x39   :  { %1831 = vmatprep.subr.bf16.mxu1 %v2607_v3  ;;  %v2694_v3 = vld [vmem:[%s3906_s2 + $0x1c4] ss:$8 sps:$4 sm:$0xff]  }
  0x3b   :  { %1026 = vmatpush1.bf16.msra.mxu0 %v2609_v4  ;;  %v2689_v4 = vld [vmem:[%s3905_s1 + $0x1c0] ss:$8 sps:$4 sm:$0xff]  }
  0x3c   :  { %1832 = vmatpush1.bf16.msra.mxu1 %v2610_v5  ;;  %1027 = vmatprep.subr.bf16.mxu0 %v2611_v6  ;;  %v2692_v5 = vld [vmem:[%s3906_s2 + $0x1c0] ss:$8 sps:$4 sm:$0xff]   ;;  %v2697_v6 = vld [vmem:[%s3905_s1 + $0x1d4] ss:$8 sps:$4 sm:$0xff]  }
  0x3d   :  { %1833 = vmatprep.subr.bf16.mxu1 %v2613_v7  ;;  %v2700_v7 = vld [vmem:[%s3906_s2 + $0x1d4] ss:$8 sps:$4 sm:$0xff]  }
  0x3f   :  { %1028 = vmatpush1.bf16.msra.mxu0 %v2615_v8  ;;  %v2695_v8 = vld [vmem:[%s3905_s1 + $0x1d0] ss:$8 sps:$4 sm:$0xff]  }
  0x40   :  { %1834 = vmatpush1.bf16.msra.mxu1 %v2616_v10  ;;  %1038 = vmatprep.subr.bf16.mxu0 %v2619_v11  ;;  %v2703_v10 = vld [vmem:[%s3905_s1 + $0x1e4] ss:$8 sps:$4 sm:$0xff]  }
  0x41   :  { %1844 = vmatprep.subr.bf16.mxu1 %v2622_v12  ;;  %v2706_v11 = vld [vmem:[%s3906_s2 + $0x1e4] ss:$8 sps:$4 sm:$0xff]   ;;  %v2701_v12 = vld [vmem:[%s3905_s1 + $0x1e0] ss:$8 sps:$4 sm:$0xff]  }
  0x42   :  { %1030 = vmatmul.mubr.bf16.vlgmr.msra.gmra.mrb[0].mxu0 %v3193_v15 }
  0x43   :  { %1836 = vmatmul.mubr.bf16.vlgmr.msra.gmra.mrb[0].mxu1 %v3193_v15  ;;  %1039 = vmatpush1.bf16.msra.mxu0 %v2617_v14  ;;  %v2709_v14 = vld [vmem:[%s3905_s1 + $0x1f4] ss:$8 sps:$4 sm:$0xff]  }
  0x44   :  { %1845 = vmatpush1.bf16.msra.mxu1 %v2620_v17  ;;  %1040 = vmatprep.subr.bf16.mxu0 %v2625_v18  ;;  %v2707_v17 = vld [vmem:[%s3905_s1 + $0x1f0] ss:$8 sps:$4 sm:$0xff]  }
  0x45   :  { %1846 = vmatprep.subr.bf16.mxu1 %v2628_v19  ;;  %1070 = vmatprep.mubr.bf16.mxu0 %v347_v22  ;;  %v2710_v18 = vld [vmem:[%s3906_s2 + $0x1f0] ss:$8 sps:$4 sm:$0xff]   ;;  %v2715_v19 = vld [vmem:[%s3905_s1 + $0x204] ss:$8 sps:$4 sm:$0xff]  }
  0x46   :  { %1876 = vmatprep.mubr.bf16.mxu1 %v347_v22  ;;  %v2718_v22 = vld [vmem:[%s3906_s2 + $0x204] ss:$8 sps:$4 sm:$0xff]  }
  0x47   :  { %1041 = vmatpush1.bf16.msra.mxu0 %v2623_v23  ;;  %v2713_v23 = vld [vmem:[%s3905_s1 + $0x200] ss:$8 sps:$4 sm:$0xff]  }
  0x48   :  { %1847 = vmatpush1.bf16.msra.mxu1 %v2626_v24  ;;  %1042 = vmatprep.subr.bf16.mxu0 %v2631_v25  ;;  %v345_v24 = vcombine.high %v3193_v15, %v3193_v15  ;;  %v2716_v25 = vld [vmem:[%s3906_s2 + $0x200] ss:$8 sps:$4 sm:$0xff]   ;;  %v2719_v15 = vld [vmem:[%s3905_s1 + $0x210] ss:$8 sps:$4 sm:$0xff]  }
  0x49   :  { %1848 = vmatprep.subr.bf16.mxu1 %v2634_v26  ;;  %v2721_v26 = vld [vmem:[%s3905_s1 + $0x214] ss:$8 sps:$4 sm:$0xff]  }
  0x4b   :  { %1043 = vmatpush1.bf16.msra.mxu0 %v2629_v27  ;;  %v2724_v27 = vld [vmem:[%s3906_s2 + $0x214] ss:$8 sps:$4 sm:$0xff]  }
  0x4c   :  { %1849 = vmatpush1.bf16.msra.mxu1 %v2632_v28  ;;  %1044 = vmatprep.subr.bf16.mxu0 %v2637_v29  ;;  %v2722_v28 = vld [vmem:[%s3906_s2 + $0x210] ss:$8 sps:$4 sm:$0xff]   ;;  %v2727_v29 = vld [vmem:[%s3905_s1 + $0x224] ss:$8 sps:$4 sm:$0xff]  }
  0x4d   :  { %1850 = vmatprep.subr.bf16.mxu1 %v2640_v30  ;;  %v2730_v30 = vld [vmem:[%s3906_s2 + $0x224] ss:$8 sps:$4 sm:$0xff]  }
  0x4f   :  { %1045 = vmatpush1.bf16.msra.mxu0 %v2635_v31  ;;  %v2725_v31 = vld [vmem:[%s3905_s1 + $0x220] ss:$8 sps:$4 sm:$0xff]  }
  0x50   :  { %1851 = vmatpush1.bf16.msra.mxu1 %v2638_v32  ;;  %1046 = vmatprep.subr.bf16.mxu0 %v2643_v33  ;;  %v2728_v32 = vld [vmem:[%s3906_s2 + $0x220] ss:$8 sps:$4 sm:$0xff]   ;;  %v2733_v33 = vld [vmem:[%s3905_s1 + $0x234] ss:$8 sps:$4 sm:$0xff]  }
  0x51   :  { %1852 = vmatprep.subr.bf16.mxu1 %v2646_v34  ;;  %v2736_v34 = vld [vmem:[%s3906_s2 + $0x234] ss:$8 sps:$4 sm:$0xff]  }
  0x53   :  { %1047 = vmatpush1.bf16.msra.mxu0 %v2641_v35  ;;  %v2731_v35 = vld [vmem:[%s3905_s1 + $0x230] ss:$8 sps:$4 sm:$0xff]  }
  0x54   :  { %1853 = vmatpush1.bf16.msra.mxu1 %v2644_v36  ;;  %1048 = vmatprep.subr.bf16.mxu0 %v2649_v37  ;;  %v2734_v36 = vld [vmem:[%s3906_s2 + $0x230] ss:$8 sps:$4 sm:$0xff]   ;;  %v2739_v37 = vld [vmem:[%s3905_s1 + $0x244] ss:$8 sps:$4 sm:$0xff]  }
  0x55   :  { %1854 = vmatprep.subr.bf16.mxu1 %v2652_v38  ;;  %v2742_v38 = vld [vmem:[%s3906_s2 + $0x244] ss:$8 sps:$4 sm:$0xff]  }
  0x57   :  { %1049 = vmatpush1.bf16.msra.mxu0 %v2647_v39  ;;  %v2737_v39 = vld [vmem:[%s3905_s1 + $0x240] ss:$8 sps:$4 sm:$0xff]  }
  0x58   :  { %1855 = vmatpush1.bf16.msra.mxu1 %v2650_v40  ;;  %1050 = vmatprep.subr.bf16.mxu0 %v2655_v41  ;;  %v2740_v40 = vld [vmem:[%s3906_s2 + $0x240] ss:$8 sps:$4 sm:$0xff]   ;;  %v2745_v41 = vld [vmem:[%s3905_s1 + $0x254] ss:$8 sps:$4 sm:$0xff]  }
  0x59   :  { %1856 = vmatprep.subr.bf16.mxu1 %v2658_v43  ;;  %v2748_v43 = vld [vmem:[%s3906_s2 + $0x254] ss:$8 sps:$4 sm:$0xff]  }
  0x5b   :  { %1051 = vmatpush1.bf16.msra.mxu0 %v2653_v44  ;;  %v2743_v44 = vld [vmem:[%s3905_s1 + $0x250] ss:$8 sps:$4 sm:$0xff]  }
  0x5c   :  { %1857 = vmatpush1.bf16.msra.mxu1 %v2656_v45  ;;  %1052 = vmatprep.subr.bf16.mxu0 %v2661_v46  ;;  %v2746_v45 = vld [vmem:[%s3906_s2 + $0x250] ss:$8 sps:$4 sm:$0xff]   ;;  %v2751_v46 = vld [vmem:[%s3905_s1 + $0x264] ss:$8 sps:$4 sm:$0xff]  }
  0x5d   :  { %1858 = vmatprep.subr.bf16.mxu1 %v2664_v47  ;;  %v2754_v47 = vld [vmem:[%s3906_s2 + $0x264] ss:$8 sps:$4 sm:$0xff]  }
  0x5f   :  { %1053 = vmatpush1.bf16.msra.mxu0 %v2659_v48  ;;  %v2749_v48 = vld [vmem:[%s3905_s1 + $0x260] ss:$8 sps:$4 sm:$0xff]  }
  0x60   :  { %1859 = vmatpush1.bf16.msra.mxu1 %v2662_v49  ;;  %1054 = vmatprep.subr.bf16.mxu0 %v2667_v50  ;;  %v2752_v49 = vld [vmem:[%s3906_s2 + $0x260] ss:$8 sps:$4 sm:$0xff]   ;;  %v2757_v50 = vld [vmem:[%s3905_s1 + $0x274] ss:$8 sps:$4 sm:$0xff]  }
  0x61   :  { %1860 = vmatprep.subr.bf16.mxu1 %v2670_v51  ;;  %v2760_v51 = vld [vmem:[%s3906_s2 + $0x274] ss:$8 sps:$4 sm:$0xff]  }
  0x63   :  { %1055 = vmatpush1.bf16.msra.mxu0 %v2665_v52  ;;  %v2755_v52 = vld [vmem:[%s3905_s1 + $0x270] ss:$8 sps:$4 sm:$0xff]  }
  0x64   :  { %1861 = vmatpush1.bf16.msra.mxu1 %v2668_v53  ;;  %1056 = vmatprep.subr.bf16.mxu0 %v2673_v54  ;;  %v2758_v53 = vld [vmem:[%s3906_s2 + $0x270] ss:$8 sps:$4 sm:$0xff]   ;;  %v2763_v54 = vld [vmem:[%s3905_s1 + $0x284] ss:$8 sps:$4 sm:$0xff]  }
  0x65   :  { %1862 = vmatprep.subr.bf16.mxu1 %v2676_v55  ;;  %v2766_v55 = vld [vmem:[%s3906_s2 + $0x284] ss:$8 sps:$4 sm:$0xff]  }
  0x67   :  { %1057 = vmatpush1.bf16.msra.mxu0 %v2671_v56  ;;  %v2761_v56 = vld [vmem:[%s3905_s1 + $0x280] ss:$8 sps:$4 sm:$0xff]  }
  0x68   :  { %1863 = vmatpush1.bf16.msra.mxu1 %v2674_v57  ;;  %1058 = vmatprep.subr.bf16.mxu0 %v2679_v58  ;;  %v2764_v57 = vld [vmem:[%s3906_s2 + $0x280] ss:$8 sps:$4 sm:$0xff]   ;;  %v2769_v58 = vld [vmem:[%s3905_s1 + $0x294] ss:$8 sps:$4 sm:$0xff]  }
  0x69   :  { %1864 = vmatprep.subr.bf16.mxu1 %v2682_v59  ;;  %v2772_v59 = vld [vmem:[%s3906_s2 + $0x294] ss:$8 sps:$4 sm:$0xff]  }
  0x6b   :  { %1059 = vmatpush1.bf16.msra.mxu0 %v2677_v60  ;;  %v2767_v60 = vld [vmem:[%s3905_s1 + $0x290] ss:$8 sps:$4 sm:$0xff]  }
  0x6c   :  { %1865 = vmatpush1.bf16.msra.mxu1 %v2680_v61  ;;  %1060 = vmatprep.subr.bf16.mxu0 %v2685_v62  ;;  %v2770_v61 = vld [vmem:[%s3906_s2 + $0x290] ss:$8 sps:$4 sm:$0xff]   ;;  %v2775_v62 = vld [vmem:[%s3905_s1 + $0x2a4] ss:$8 sps:$4 sm:$0xff]  }
  0x6d   :  { %1866 = vmatprep.subr.bf16.mxu1 %v2688_v63  ;;  %v2778_v63 = vld [vmem:[%s3906_s2 + $0x2a4] ss:$8 sps:$4 sm:$0xff]  }
  0x6f   :  { %1061 = vmatpush1.bf16.msra.mxu0 %v2683_v0  ;;  %v2773_v0 = vld [vmem:[%s3905_s1 + $0x2a0] ss:$8 sps:$4 sm:$0xff]  }
  0x70   :  { %1867 = vmatpush1.bf16.msra.mxu1 %v2686_v1  ;;  %1062 = vmatprep.subr.bf16.mxu0 %v2691_v2  ;;  %v2776_v1 = vld [vmem:[%s3906_s2 + $0x2a0] ss:$8 sps:$4 sm:$0xff]   ;;  %v2781_v2 = vld [vmem:[%s3905_s1 + $0x2b4] ss:$8 sps:$4 sm:$0xff]  }
  0x71   :  { %1868 = vmatprep.subr.bf16.mxu1 %v2694_v3  ;;  %v2784_v3 = vld [vmem:[%s3906_s2 + $0x2b4] ss:$8 sps:$4 sm:$0xff]  }
  0x73   :  { %1063 = vmatpush1.bf16.msra.mxu0 %v2689_v4  ;;  %v2779_v4 = vld [vmem:[%s3905_s1 + $0x2b0] ss:$8 sps:$4 sm:$0xff]  }
  0x74   :  { %1869 = vmatpush1.bf16.msra.mxu1 %v2692_v5  ;;  %1064 = vmatprep.subr.bf16.mxu0 %v2697_v6  ;;  %v2782_v5 = vld [vmem:[%s3906_s2 + $0x2b0] ss:$8 sps:$4 sm:$0xff]   ;;  %v2787_v6 = vld [vmem:[%s3905_s1 + $0x2c4] ss:$8 sps:$4 sm:$0xff]  }
  0x75   :  { %1870 = vmatprep.subr.bf16.mxu1 %v2700_v7  ;;  %v2790_v7 = vld [vmem:[%s3906_s2 + $0x2c4] ss:$8 sps:$4 sm:$0xff]  }
  0x77   :  { %1065 = vmatpush1.bf16.msra.mxu0 %v2695_v8  ;;  %v2785_v8 = vld [vmem:[%s3905_s1 + $0x2c0] ss:$8 sps:$4 sm:$0xff]  }
  0x78   :  { %1871 = vmatpush1.bf16.msra.mxu1 %v2698_v9  ;;  %1066 = vmatprep.subr.bf16.mxu0 %v2703_v10  ;;  %v2788_v9 = vld [vmem:[%s3906_s2 + $0x2c0] ss:$8 sps:$4 sm:$0xff]   ;;  %v2793_v10 = vld [vmem:[%s3905_s1 + $0x2d4] ss:$8 sps:$4 sm:$0xff]  }
  0x79   :  { %1872 = vmatprep.subr.bf16.mxu1 %v2706_v11  ;;  %v2796_v11 = vld [vmem:[%s3906_s2 + $0x2d4] ss:$8 sps:$4 sm:$0xff]  }
  0x7b   :  { %1067 = vmatpush1.bf16.msra.mxu0 %v2701_v12 }
  0x7c   :  { %1873 = vmatpush1.bf16.msra.mxu1 %v2704_v13  ;;  %1068 = vmatprep.subr.bf16.mxu0 %v2709_v14 }
  0x7d   :  { %1874 = vmatprep.subr.bf16.mxu1 %v2712_v16 }
  0x7f   :  { %1069 = vmatpush1.bf16.msra.mxu0 %v2707_v17 }
  0x80   :  { %1875 = vmatpush1.bf16.msra.mxu1 %v2710_v18  ;;  %1079 = vmatprep.subr.bf16.mxu0 %v2715_v19 }
  0x81   :  { %1885 = vmatprep.subr.bf16.mxu1 %v2718_v22 }
  0x82   :  { %1071 = vmatmul.mubr.bf16.vlgmr.msra.gmra.mrb[0].mxu0 %v345_v24 }
  0x83   :  { %1877 = vmatmul.mubr.bf16.vlgmr.msra.gmra.mrb[0].mxu1 %v345_v24  ;;  %1080 = vmatpush1.bf16.msra.mxu0 %v2713_v23 }
  0x84   :  { %1886 = vmatpush1.bf16.msra.mxu1 %v2716_v25  ;;  %1081 = vmatprep.subr.bf16.mxu0 %v2721_v26 }
  0x85   :  { %1887 = vmatprep.subr.bf16.mxu1 %v2724_v27  ;;  %1111 = vmatprep.mubr.bf16.mxu0 %v3205_v20 }
  0x86   :  { %1917 = vmatprep.mubr.bf16.mxu1 %v3205_v20 }
  0x87   :  { %1082 = vmatpush1.bf16.msra.mxu0 %v2719_v15 }
  0x88   :  { %1888 = vmatpush1.bf16.msra.mxu1 %v2722_v28  ;;  %1083 = vmatprep.subr.bf16.mxu0 %v2727_v29 }
  0x89   :  { %1889 = vmatprep.subr.bf16.mxu1 %v2730_v30 }
  0x8b   :  { %1084 = vmatpush1.bf16.msra.mxu0 %v2725_v31 }
  0x8c   :  { %1890 = vmatpush1.bf16.msra.mxu1 %v2728_v32  ;;  %1085 = vmatprep.subr.bf16.mxu0 %v2733_v33 }
  0x8d   :  { %1891 = vmatprep.subr.bf16.mxu1 %v2736_v34 }
  0x8f   :  { %1086 = vmatpush1.bf16.msra.mxu0 %v2731_v35 }
  0x90   :  { %1892 = vmatpush1.bf16.msra.mxu1 %v2734_v36  ;;  %1087 = vmatprep.subr.bf16.mxu0 %v2739_v37 }
  0x91   :  { %1893 = vmatprep.subr.bf16.mxu1 %v2742_v38 }
  0x93   :  { %1088 = vmatpush1.bf16.msra.mxu0 %v2737_v39 }
  0x94   :  { %1894 = vmatpush1.bf16.msra.mxu1 %v2740_v40  ;;  %1089 = vmatprep.subr.bf16.mxu0 %v2745_v41 }
  0x95   :  { %1895 = vmatprep.subr.bf16.mxu1 %v2748_v43 }
  0x97   :  { %1090 = vmatpush1.bf16.msra.mxu0 %v2743_v44 }
  0x98   :  { %1896 = vmatpush1.bf16.msra.mxu1 %v2746_v45  ;;  %1091 = vmatprep.subr.bf16.mxu0 %v2751_v46 }
  0x99   :  { %1897 = vmatprep.subr.bf16.mxu1 %v2754_v47 }
  0x9b   :  { %1092 = vmatpush1.bf16.msra.mxu0 %v2749_v48 }
  0x9c   :  { %1898 = vmatpush1.bf16.msra.mxu1 %v2752_v49  ;;  %1093 = vmatprep.subr.bf16.mxu0 %v2757_v50 }
  0x9d   :  { %1899 = vmatprep.subr.bf16.mxu1 %v2760_v51 }
  0x9f   :  { %1094 = vmatpush1.bf16.msra.mxu0 %v2755_v52 }
  0xa0   :  { %1900 = vmatpush1.bf16.msra.mxu1 %v2758_v53  ;;  %1095 = vmatprep.subr.bf16.mxu0 %v2763_v54 }
  0xa1   :  { %1901 = vmatprep.subr.bf16.mxu1 %v2766_v55 }
  0xa3   :  { %1096 = vmatpush1.bf16.msra.mxu0 %v2761_v56 }
  0xa4   :  { %1902 = vmatpush1.bf16.msra.mxu1 %v2764_v57  ;;  %1097 = vmatprep.subr.bf16.mxu0 %v2769_v58 }
  0xa5   :  { %1903 = vmatprep.subr.bf16.mxu1 %v2772_v59 }
  0xa7   :  { %1098 = vmatpush1.bf16.msra.mxu0 %v2767_v60 }
  0xa8   :  { %1904 = vmatpush1.bf16.msra.mxu1 %v2770_v61  ;;  %1099 = vmatprep.subr.bf16.mxu0 %v2775_v62 }
  0xa9   :  { %1905 = vmatprep.subr.bf16.mxu1 %v2778_v63 }
  0xab   :  { %1100 = vmatpush1.bf16.msra.mxu0 %v2773_v0 }
  0xac   :  { %1906 = vmatpush1.bf16.msra.mxu1 %v2776_v1  ;;  %1101 = vmatprep.subr.bf16.mxu0 %v2781_v2 }
  0xad   :  { %1907 = vmatprep.subr.bf16.mxu1 %v2784_v3 }
  0xaf   :  { %1102 = vmatpush1.bf16.msra.mxu0 %v2779_v4 }
  0xb0   :  { %1908 = vmatpush1.bf16.msra.mxu1 %v2782_v5  ;;  %1103 = vmatprep.subr.bf16.mxu0 %v2787_v6 }
  0xb1   :  { %1909 = vmatprep.subr.bf16.mxu1 %v2790_v7 }
  0xb2   :  { %13 = vsyncpa [#allocation3], 0  ;;  %v2791_v12 = vld [vmem:[%s3905_s1 + $0x2d0] ss:$8 sps:$4 sm:$0xff]   ;;  %v2799_v14 = vld [vmem:[%s3905_s1 + $0x2e4] ss:$8 sps:$4 sm:$0xff]   ;;  %v348_v30 = vcombine.high %v3205_v20, %v3205_v20 }
  0xb3   :  { %1104 = vmatpush1.bf16.msra.mxu0 %v2785_v8  ;;  %v2794_v13 = vld [vmem:[%s3906_s2 + $0x2d0] ss:$8 sps:$4 sm:$0xff]   ;;  %v2802_v16 = vld [vmem:[%s3906_s2 + $0x2e4] ss:$8 sps:$4 sm:$0xff]   ;;  %v2797_v17 = vld [vmem:[%s3905_s1 + $0x2e0] ss:$8 sps:$4 sm:$0xff]  }
  0xb4   :  { %1910 = vmatpush1.bf16.msra.mxu1 %v2788_v9  ;;  %1105 = vmatprep.subr.bf16.mxu0 %v2793_v10  ;;  %v2800_v18 = vld [vmem:[%s3906_s2 + $0x2e0] ss:$8 sps:$4 sm:$0xff]   ;;  %v2805_v19 = vld [vmem:[%s3905_s1 + $0x2f4] ss:$8 sps:$4 sm:$0xff]   ;;  %v2803_v23 = vld [vmem:[%s3905_s1 + $0x2f0] ss:$8 sps:$4 sm:$0xff]  }
  0xb5   :  { %1911 = vmatprep.subr.bf16.mxu1 %v2796_v11  ;;  %v2808_v22 = vld [vmem:[%s3906_s2 + $0x2f4] ss:$8 sps:$4 sm:$0xff]   ;;  %v2806_v24 = vld [vmem:[%s3906_s2 + $0x2f0] ss:$8 sps:$4 sm:$0xff]   ;;  %v2812_v25 = vld [vmem:[%s3905_s1 + $0x304] ss:$8 sps:$4 sm:$0xff]  }
  0xb6   :  { %v2815_v26 = vld [vmem:[%s3906_s2 + $0x304] ss:$8 sps:$4 sm:$0xff]   ;;  %v2810_v27 = vld [vmem:[%s3905_s1 + $0x300] ss:$8 sps:$4 sm:$0xff]   ;;  %v2818_v28 = vld [vmem:[%s3905_s1 + $0x314] ss:$8 sps:$4 sm:$0xff]  }
  0xb7   :  { %1106 = vmatpush1.bf16.msra.mxu0 %v2791_v12  ;;  %v2813_v15 = vld [vmem:[%s3906_s2 + $0x300] ss:$8 sps:$4 sm:$0xff]   ;;  %v2821_v29 = vld [vmem:[%s3906_s2 + $0x314] ss:$8 sps:$4 sm:$0xff]   ;;  %v2816_v31 = vld [vmem:[%s3905_s1 + $0x310] ss:$8 sps:$4 sm:$0xff]  }
  0xb8   :  { %1912 = vmatpush1.bf16.msra.mxu1 %v2794_v13  ;;  %1107 = vmatprep.subr.bf16.mxu0 %v2799_v14  ;;  %v2819_v32 = vld [vmem:[%s3906_s2 + $0x310] ss:$8 sps:$4 sm:$0xff]   ;;  %v2824_v20 = vld [vmem:[%s3905_s1 + $0x324] ss:$8 sps:$4 sm:$0xff]   ;;  %v2822_v34 = vld [vmem:[%s3905_s1 + $0x320] ss:$8 sps:$4 sm:$0xff]  }
  0xb9   :  { %1913 = vmatprep.subr.bf16.mxu1 %v2802_v16  ;;  %v2827_v33 = vld [vmem:[%s3906_s2 + $0x324] ss:$8 sps:$4 sm:$0xff]   ;;  %v2825_v35 = vld [vmem:[%s3906_s2 + $0x320] ss:$8 sps:$4 sm:$0xff]   ;;  %v2830_v36 = vld [vmem:[%s3905_s1 + $0x334] ss:$8 sps:$4 sm:$0xff]  }
  0xba   :  { %v2833_v37 = vld [vmem:[%s3906_s2 + $0x334] ss:$8 sps:$4 sm:$0xff]   ;;  %v2828_v38 = vld [vmem:[%s3905_s1 + $0x330] ss:$8 sps:$4 sm:$0xff]   ;;  %v2836_v40 = vld [vmem:[%s3905_s1 + $0x344] ss:$8 sps:$4 sm:$0xff]  }
  0xbb   :  { %1108 = vmatpush1.bf16.msra.mxu0 %v2797_v17  ;;  %v2831_v39 = vld [vmem:[%s3906_s2 + $0x330] ss:$8 sps:$4 sm:$0xff]   ;;  %v2839_v41 = vld [vmem:[%s3906_s2 + $0x344] ss:$8 sps:$4 sm:$0xff]   ;;  %v2834_v43 = vld [vmem:[%s3905_s1 + $0x340] ss:$8 sps:$4 sm:$0xff]  }
  0xbc   :  { %1914 = vmatpush1.bf16.msra.mxu1 %v2800_v18  ;;  %1109 = vmatprep.subr.bf16.mxu0 %v2805_v19  ;;  %v2837_v44 = vld [vmem:[%s3906_s2 + $0x340] ss:$8 sps:$4 sm:$0xff]   ;;  %v2842_v45 = vld [vmem:[%s3905_s1 + $0x354] ss:$8 sps:$4 sm:$0xff]   ;;  %v2840_v47 = vld [vmem:[%s3905_s1 + $0x350] ss:$8 sps:$4 sm:$0xff]  }
  0xbd   :  { %1915 = vmatprep.subr.bf16.mxu1 %v2808_v22  ;;  %v2845_v46 = vld [vmem:[%s3906_s2 + $0x354] ss:$8 sps:$4 sm:$0xff]   ;;  %v2843_v48 = vld [vmem:[%s3906_s2 + $0x350] ss:$8 sps:$4 sm:$0xff]   ;;  %v2848_v49 = vld [vmem:[%s3905_s1 + $0x364] ss:$8 sps:$4 sm:$0xff]  }
  0xbe   :  { %v2851_v50 = vld [vmem:[%s3906_s2 + $0x364] ss:$8 sps:$4 sm:$0xff]   ;;  %v2846_v51 = vld [vmem:[%s3905_s1 + $0x360] ss:$8 sps:$4 sm:$0xff]   ;;  %v2854_v53 = vld [vmem:[%s3905_s1 + $0x374] ss:$8 sps:$4 sm:$0xff]  }
  0xbf   :  { %1110 = vmatpush1.bf16.msra.mxu0 %v2803_v23  ;;  %v2849_v52 = vld [vmem:[%s3906_s2 + $0x360] ss:$8 sps:$4 sm:$0xff]   ;;  %v2857_v54 = vld [vmem:[%s3906_s2 + $0x374] ss:$8 sps:$4 sm:$0xff]   ;;  %v2852_v55 = vld [vmem:[%s3905_s1 + $0x370] ss:$8 sps:$4 sm:$0xff]  }
  0xc0   :  { %1916 = vmatpush1.bf16.msra.mxu1 %v2806_v24  ;;  %1120 = vmatprep.subr.bf16.mxu0 %v2812_v25  ;;  %v2855_v56 = vld [vmem:[%s3906_s2 + $0x370] ss:$8 sps:$4 sm:$0xff]   ;;  %v2860_v57 = vld [vmem:[%s3905_s1 + $0x384] ss:$8 sps:$4 sm:$0xff]   ;;  %v2858_v59 = vld [vmem:[%s3905_s1 + $0x380] ss:$8 sps:$4 sm:$0xff]  }
  0xc1   :  { %1926 = vmatprep.subr.bf16.mxu1 %v2815_v26  ;;  %v2863_v58 = vld [vmem:[%s3906_s2 + $0x384] ss:$8 sps:$4 sm:$0xff]   ;;  %v2861_v60 = vld [vmem:[%s3906_s2 + $0x380] ss:$8 sps:$4 sm:$0xff]   ;;  %v2866_v61 = vld [vmem:[%s3905_s1 + $0x394] ss:$8 sps:$4 sm:$0xff]  }
  0xc2   :  { %1112 = vmatmul.mubr.bf16.vlgmr.msra.gmra.mrb[0].mxu0 %v3208_v21  ;;  %v2869_v62 = vld [vmem:[%s3906_s2 + $0x394] ss:$8 sps:$4 sm:$0xff]   ;;  %v2864_v63 = vld [vmem:[%s3905_s1 + $0x390] ss:$8 sps:$4 sm:$0xff]   ;;  %v2872_v1 = vld [vmem:[%s3905_s1 + $0x3a4] ss:$8 sps:$4 sm:$0xff]  }
  0xc3   :  { %1918 = vmatmul.mubr.bf16.vlgmr.msra.gmra.mrb[0].mxu1 %v3208_v21  ;;  %1121 = vmatpush1.bf16.msra.mxu0 %v2810_v27  ;;  %v2867_v0 = vld [vmem:[%s3906_s2 + $0x390] ss:$8 sps:$4 sm:$0xff]   ;;  %v2875_v2 = vld [vmem:[%s3906_s2 + $0x3a4] ss:$8 sps:$4 sm:$0xff]   ;;  %v2870_v3 = vld [vmem:[%s3905_s1 + $0x3a0] ss:$8 sps:$4 sm:$0xff]  }
  0xc4   :  { %1927 = vmatpush1.bf16.msra.mxu1 %v2813_v15  ;;  %1122 = vmatprep.subr.bf16.mxu0 %v2818_v28  ;;  %v2873_v4 = vld [vmem:[%s3906_s2 + $0x3a0] ss:$8 sps:$4 sm:$0xff]   ;;  %v2878_v5 = vld [vmem:[%s3905_s1 + $0x3b4] ss:$8 sps:$4 sm:$0xff]   ;;  %v2876_v7 = vld [vmem:[%s3905_s1 + $0x3b0] ss:$8 sps:$4 sm:$0xff]  }
  0xc5   :  { %1928 = vmatprep.subr.bf16.mxu1 %v2821_v29  ;;  %1152 = vmatprep.mubr.bf16.mxu0 %v348_v30  ;;  %v2881_v6 = vld [vmem:[%s3906_s2 + $0x3b4] ss:$8 sps:$4 sm:$0xff]   ;;  %v2879_v8 = vld [vmem:[%s3906_s2 + $0x3b0] ss:$8 sps:$4 sm:$0xff]   ;;  %v2884_v9 = vld [vmem:[%s3905_s1 + $0x3c4] ss:$8 sps:$4 sm:$0xff]   ;;  %v346_v29 = vcombine.high %v3208_v21, %v3208_v21 }
  0xc6   :  { %1958 = vmatprep.mubr.bf16.mxu1 %v348_v30  ;;  %v2887_v10 = vld [vmem:[%s3906_s2 + $0x3c4] ss:$8 sps:$4 sm:$0xff]   ;;  %v2882_v11 = vld [vmem:[%s3905_s1 + $0x3c0] ss:$8 sps:$4 sm:$0xff]   ;;  %v2890_v13 = vld [vmem:[%s3905_s1 + $0x3d4] ss:$8 sps:$4 sm:$0xff]  }
  0xc7   :  { %1123 = vmatpush1.bf16.msra.mxu0 %v2816_v31  ;;  %v2885_v12 = vld [vmem:[%s3906_s2 + $0x3c0] ss:$8 sps:$4 sm:$0xff]   ;;  %v2893_v14 = vld [vmem:[%s3906_s2 + $0x3d4] ss:$8 sps:$4 sm:$0xff]   ;;  %v2888_v16 = vld [vmem:[%s3905_s1 + $0x3d0] ss:$8 sps:$4 sm:$0xff]  }
  0xc8   :  { %1929 = vmatpush1.bf16.msra.mxu1 %v2819_v32  ;;  %1124 = vmatprep.subr.bf16.mxu0 %v2824_v20  ;;  %v2891_v17 = vld [vmem:[%s3906_s2 + $0x3d0] ss:$8 sps:$4 sm:$0xff]   ;;  %v2896_v18 = vld [vmem:[%s3905_s1 + $0x3e4] ss:$8 sps:$4 sm:$0xff]   ;;  %v2894_v22 = vld [vmem:[%s3905_s1 + $0x3e0] ss:$8 sps:$4 sm:$0xff]  }
  0xc9   :  { %1930 = vmatprep.subr.bf16.mxu1 %v2827_v33  ;;  %v2899_v19 = vld [vmem:[%s3906_s2 + $0x3e4] ss:$8 sps:$4 sm:$0xff]   ;;  %v2897_v23 = vld [vmem:[%s3906_s2 + $0x3e0] ss:$8 sps:$4 sm:$0xff]   ;;  %v2902_v24 = vld [vmem:[%s3905_s1 + $0x3f4] ss:$8 sps:$4 sm:$0xff]  }
  0xca   :  { %v2905_v25 = vld [vmem:[%s3906_s2 + $0x3f4] ss:$8 sps:$4 sm:$0xff]   ;;  %v2900_v26 = vld [vmem:[%s3905_s1 + $0x3f0] ss:$8 sps:$4 sm:$0xff]   ;;  %v1971_v15 = vld [vmem:[%s3908_s4] sm:$0xff]  ;;  %v2931_v31 = vmov 0.0|0.0  }
  0xcb   :  { %1125 = vmatpush1.bf16.msra.mxu0 %v2822_v34  ;;  %v2903_v27 = vld [vmem:[%s3906_s2 + $0x3f0] ss:$8 sps:$4 sm:$0xff]   ;;  %v1972_v28 = vld [vmem:[%s3908_s4 + $0x8] sm:$0xff]  ;;  %v1975_v21 = vld [vmem:[%s3908_s4 + $0x20] sm:$0xff]  ;;  %vm2006_vm0 = vcmask 785408   ;;  %vm2933_vm1 = vmmov 0  }
  0xcc   :  { %1931 = vmatpush1.bf16.msra.mxu1 %v2825_v35  ;;  %1126 = vmatprep.subr.bf16.mxu0 %v2830_v36  ;;  %v2447_v30 = vpack.c.bf16 %v1972_v28, %v1971_v15  ;;  %v1973_v32 = vld [vmem:[%s3908_s4 + $0x10] sm:$0xff]  ;;  %v1974_v20 = vld [vmem:[%s3908_s4 + $0x18] sm:$0xff]  ;;  %v1976_v34 = vld [vmem:[%s3908_s4 + $0x28] sm:$0xff]  ;;  %vm2089_vm2 = vcmask 64512   ;;  %s2934_s25 = smov [#allocation2]   ;;  %vm2163_vm3 = vcmask 25600  }
  0xcd   :  { %1932 = vmatprep.subr.bf16.mxu1 %v2833_v37  ;;  %v2450_v33 = vpack.c.bf16 %v1974_v20, %v1973_v32  ;;  %v2453_v35 = vpack.c.bf16 %v1976_v34, %v1975_v21  ;;  %v1977_v36 = vld [vmem:[%s3908_s4 + $0x30] sm:$0xff]  ;;  %v1978_v37 = vld [vmem:[%s3908_s4 + $0x38] sm:$0xff]  ;;  %v2435_v32 = vld [vmem:[%s3909_s5] ss:$0 sm:$0xff]  ;;  %s2171_s26 = sshll.u32 %s2934_s25, 4  ;;  %s2172_s26 = int_to_ptr.vmem [resolvable:$true] %s2171_s26 }
  0xce   :  { %s2906_s27 = scalar_lea.vmem %s2172_s26, 32  ;;  %p2911_p1 = scmp.lt.s32.totalorder %s2172_s26, %s2172_s26 }
  0xcf   :  { %1127 = vmatpush1.bf16.msra.mxu0 %v2828_v38  ;;  %v2456_v38 = vpack.c.bf16 %v1978_v37, %v1977_v36  ;;  %p2907_p0 = scmp.ne.s32.totalorder %s2172_s26, %s2906_s27  ;;  %p2912_p2 = scmp.lt.s32.totalorder %s2906_s27, %s2906_s27 }
  0xd0   :  { %1933 = vmatpush1.bf16.msra.mxu1 %v2831_v39  ;;  %1128 = vmatprep.subr.bf16.mxu0 %v2836_v40  ;;  %v1979_v39 = vld [vmem:[%s3908_s4 + $0x40] sm:$0xff]  ;;  %v1980_v40 = vld [vmem:[%s3908_s4 + $0x48] sm:$0xff] }
  0xd1   :  { %1934 = vmatprep.subr.bf16.mxu1 %v2839_v41  ;;  %v2459_v41 = vpack.c.bf16 %v1980_v40, %v1979_v39  ;;  %p2913_p3 = por %p2912_p2, %p2911_p1 }
  0xd3   :  { %1129 = vmatpush1.bf16.msra.mxu0 %v2834_v43  ;;  %v1981_v43 = vld [vmem:[%s3908_s4 + $0x50] sm:$0xff]  ;;  %p2914_p4 = pnand %p2913_p3, %p2907_p0 }
  0xd4   :  { %1935 = vmatpush1.bf16.msra.mxu1 %v2837_v44  ;;  %1130 = vmatprep.subr.bf16.mxu0 %v2842_v45  ;;  %v1982_v44 = vld [vmem:[%s3908_s4 + $0x58] sm:$0xff] }
  0xd5   :  { %1936 = vmatprep.subr.bf16.mxu1 %v2845_v46  ;;  %v2462_v45 = vpack.c.bf16 %v1982_v44, %v1981_v43  ;;  %v1983_v46 = vld [vmem:[%s3908_s4 + $0x60] sm:$0xff] }
  0xd7   :  { %1131 = vmatpush1.bf16.msra.mxu0 %v2840_v47  ;;  %v1984_v47 = vld [vmem:[%s3908_s4 + $0x68] sm:$0xff] }
  0xd8   :  { %1937 = vmatpush1.bf16.msra.mxu1 %v2843_v48  ;;  %1132 = vmatprep.subr.bf16.mxu0 %v2848_v49  ;;  %v2465_v48 = vpack.c.bf16 %v1984_v47, %v1983_v46  ;;  %v1985_v49 = vld [vmem:[%s3908_s4 + $0x70] sm:$0xff] }
  0xd9   :  { %1938 = vmatprep.subr.bf16.mxu1 %v2851_v50  ;;  %v1986_v50 = vld [vmem:[%s3908_s4 + $0x78] sm:$0xff] }
  0xdb   :  { %1133 = vmatpush1.bf16.msra.mxu0 %v2846_v51  ;;  %v2468_v51 = vpack.c.bf16 %v1986_v50, %v1985_v49 }
  0xdc   :  { %1939 = vmatpush1.bf16.msra.mxu1 %v2849_v52  ;;  %1134 = vmatprep.subr.bf16.mxu0 %v2854_v53  ;;  %v1987_v52 = vld [vmem:[%s3908_s4 + $0x80] sm:$0xff]  ;;  %v1988_v53 = vld [vmem:[%s3908_s4 + $0x88] sm:$0xff] }
  0xdd   :  { %1940 = vmatprep.subr.bf16.mxu1 %v2857_v54  ;;  %v2471_v54 = vpack.c.bf16 %v1988_v53, %v1987_v52 }
  0xdf   :  { %1135 = vmatpush1.bf16.msra.mxu0 %v2852_v55  ;;  %v1989_v55 = vld [vmem:[%s3908_s4 + $0x90] sm:$0xff] }
  0xe0   :  { %1941 = vmatpush1.bf16.msra.mxu1 %v2855_v56  ;;  %1136 = vmatprep.subr.bf16.mxu0 %v2860_v57  ;;  %v1990_v56 = vld [vmem:[%s3908_s4 + $0x98] sm:$0xff] }
  0xe1   :  { %1942 = vmatprep.subr.bf16.mxu1 %v2863_v58  ;;  %v2474_v57 = vpack.c.bf16 %v1990_v56, %v1989_v55  ;;  %v1991_v58 = vld [vmem:[%s3908_s4 + $0xa0] sm:$0xff] }
  0xe3   :  { %1137 = vmatpush1.bf16.msra.mxu0 %v2858_v59  ;;  %v1992_v59 = vld [vmem:[%s3908_s4 + $0xa8] sm:$0xff] }
  0xe4   :  { %1943 = vmatpush1.bf16.msra.mxu1 %v2861_v60  ;;  %1138 = vmatprep.subr.bf16.mxu0 %v2866_v61  ;;  %v2477_v60 = vpack.c.bf16 %v1992_v59, %v1991_v58  ;;  %v1993_v61 = vld [vmem:[%s3908_s4 + $0xb0] sm:$0xff] }
  0xe5   :  { %1944 = vmatprep.subr.bf16.mxu1 %v2869_v62  ;;  %v1994_v62 = vld [vmem:[%s3908_s4 + $0xb8] sm:$0xff] }
  0xe7   :  { %1139 = vmatpush1.bf16.msra.mxu0 %v2864_v63  ;;  %v2480_v63 = vpack.c.bf16 %v1994_v62, %v1993_v61 }
  0xe8   :  { %1945 = vmatpush1.bf16.msra.mxu1 %v2867_v0  ;;  %1140 = vmatprep.subr.bf16.mxu0 %v2872_v1  ;;  %v1995_v0 = vld [vmem:[%s3908_s4 + $0xc0] sm:$0xff]  ;;  %v1996_v1 = vld [vmem:[%s3908_s4 + $0xc8] sm:$0xff] }
  0xe9   :  { %1946 = vmatprep.subr.bf16.mxu1 %v2875_v2  ;;  %v2483_v2 = vpack.c.bf16 %v1996_v1, %v1995_v0 }
  0xeb   :  { %1141 = vmatpush1.bf16.msra.mxu0 %v2870_v3  ;;  %v1997_v3 = vld [vmem:[%s3908_s4 + $0xd0] sm:$0xff] }
  0xec   :  { %1947 = vmatpush1.bf16.msra.mxu1 %v2873_v4  ;;  %1142 = vmatprep.subr.bf16.mxu0 %v2878_v5  ;;  %v1998_v4 = vld [vmem:[%s3908_s4 + $0xd8] sm:$0xff] }
  0xed   :  { %1948 = vmatprep.subr.bf16.mxu1 %v2881_v6  ;;  %v2486_v5 = vpack.c.bf16 %v1998_v4, %v1997_v3  ;;  %v2081_v6 = vld [vmem:[%s3910_s6] sm:$0xff] }
  0xef   :  { %1143 = vmatpush1.bf16.msra.mxu0 %v2876_v7  ;;  %v2932_v7 = vmov 0.0  }
  0xf0   :  { %1949 = vmatpush1.bf16.msra.mxu1 %v2879_v8  ;;  %1144 = vmatprep.subr.bf16.mxu0 %v2884_v9  ;;  %v291_v8 = vsub.s32 0, %v3097_v42  ;;  %v287_v9 = vld [vmem:[%s3907_s3] sm:$0x3] }
  0xf1   :  { %1950 = vmatprep.subr.bf16.mxu1 %v2887_v10  ;;  %v295_v10 = vsub.s32 1, %v3097_v42 }
  0xf3   :  { %1145 = vmatpush1.bf16.msra.mxu0 %v2882_v11  ;;  %v292_v11 = vrot.slane %v287_v9, %v291_v8 }
  0xf4   :  { %1951 = vmatpush1.bf16.msra.mxu1 %v2885_v12  ;;  %1146 = vmatprep.subr.bf16.mxu0 %v2890_v13  ;;  %v296_v12 = vrot.slane %v287_v9, %v295_v10 }
  0xf5   :  { %1952 = vmatprep.subr.bf16.mxu1 %v2893_v14 }
  0xf7   :  { %1147 = vmatpush1.bf16.msra.mxu0 %v2888_v16 }
  0xf8   :  { %1953 = vmatpush1.bf16.msra.mxu1 %v2891_v17  ;;  %1148 = vmatprep.subr.bf16.mxu0 %v2896_v18 }
  0xf9   :  { %1954 = vmatprep.subr.bf16.mxu1 %v2899_v19 }
  0xfb   :  { %1149 = vmatpush1.bf16.msra.mxu0 %v2894_v22 }
  0xfc   :  { %1955 = vmatpush1.bf16.msra.mxu1 %v2897_v23  ;;  %1150 = vmatprep.subr.bf16.mxu0 %v2902_v24 }
  0xfd   :  { %1956 = vmatprep.subr.bf16.mxu1 %v2905_v25 }
  0xff   :  { %1151 = vmatpush1.bf16.msra.mxu0 %v2900_v26 }
 0x100   :  { %1957 = vmatpush1.bf16.msra.mxu1 %v2903_v27  ;;  %2446 = vmatprep.subr.bf16.mxu0 %v2931_v31 }
 0x101   :  { %2441 = vmatprep.subr.mxu1 %v2932_v7 }
 0x102   :  { %1153 = vmatmul.mubr.bf16.vlgmr.msra.gmra.mrb[0].mxu0 %v346_v29 }
 0x103   :  { %1959 = vmatmul.mubr.bf16.vlgmr.msra.gmra.mrb[0].mxu1 %v346_v29  ;;  %2448 = vmatpush1.bf16.msra.mxu0 %v2447_v30 }
 0x104   :  { %2449 = vmatprep.subr.bf16.mxu0 %v2931_v31  ;;  %2442 = vmatpush3.msra.mxu1 %v2081_v6 }
 0x105   :  { %2443 = vmatprep.mubr.msk.f32.mxu1 %vm2933_vm1, %v2932_v7 }
 0x107   :  { %2451 = vmatpush1.bf16.msra.mxu0 %v2450_v33 }
 0x108   :  { %2452 = vmatprep.subr.bf16.mxu0 %v2931_v31 }
 0x10b   :  { %2454 = vmatpush1.bf16.msra.mxu0 %v2453_v35  ;;  %v2437_v35 = vld [vmem:[%s3911_s7] ss:$0 sm:$0xff] }
 0x10c   :  { %2455 = vmatprep.subr.bf16.mxu0 %v2931_v31 }
 0x10f   :  { %2457 = vmatpush1.bf16.msra.mxu0 %v2456_v38 }
 0x110   :  { %2458 = vmatprep.subr.bf16.mxu0 %v2931_v31 }
 0x113   :  { %2460 = vmatpush1.bf16.msra.mxu0 %v2459_v41 }
 0x114   :  { %2461 = vmatprep.subr.bf16.mxu0 %v2931_v31 }
 0x117   :  { %2463 = vmatpush1.bf16.msra.mxu0 %v2462_v45 }
 0x118   :  { %2464 = vmatprep.subr.bf16.mxu0 %v2931_v31 }
 0x11b   :  { %2466 = vmatpush1.bf16.msra.mxu0 %v2465_v48 }
 0x11c   :  { %2467 = vmatprep.subr.bf16.mxu0 %v2931_v31 }
 0x11f   :  { %2469 = vmatpush1.bf16.msra.mxu0 %v2468_v51 }
 0x120   :  { %2470 = vmatprep.subr.bf16.mxu0 %v2931_v31 }
 0x123   :  { %2472 = vmatpush1.bf16.msra.mxu0 %v2471_v54 }
 0x124   :  { %2473 = vmatprep.subr.bf16.mxu0 %v2931_v31 }
 0x127   :  { %2475 = vmatpush1.bf16.msra.mxu0 %v2474_v57 }
 0x128   :  { %2476 = vmatprep.subr.bf16.mxu0 %v2931_v31 }
 0x12b   :  { %2478 = vmatpush1.bf16.msra.mxu0 %v2477_v60 }
 0x12c   :  { %2479 = vmatprep.subr.bf16.mxu0 %v2931_v31 }
 0x12f   :  { %2481 = vmatpush1.bf16.msra.mxu0 %v2480_v63 }
 0x130   :  { %2482 = vmatprep.subr.bf16.mxu0 %v2931_v31 }
 0x133   :  { %2484 = vmatpush1.bf16.msra.mxu0 %v2483_v2 }
 0x134   :  { %2485 = vmatprep.subr.bf16.mxu0 %v2931_v31 }
 0x137   :  { %2487 = vmatpush1.bf16.msra.mxu0 %v2486_v5 }
 0x1d5   :  { %v1154_v13 = vpop.f32.mrb[0].mxu0 }
 0x1d6   :  { %v1960_v14 = vpop.f32.mrb[0].mxu1  ;;  %v2488_v16 = vadd.f32 %v1154_v13, %v292_v11  ;;  %v1156_v18 = vpop.f32.mrb[1].mxu0 }
 0x1d7   :  { %v2490_v17 = vadd.f32 %v1960_v14, %v292_v11  ;;  %v1962_v19 = vpop.f32.mrb[1].mxu1  ;;  %v2489_v22 = vadd.f32 %v1156_v18, %v296_v12  ;;  %v1158_v24 = vpop.f32.mrb[2].mxu0 }
 0x1d8   :  { %v2491_v23 = vadd.f32 %v1962_v19, %v296_v12  ;;  %v1964_v25 = vpop.f32.mrb[2].mxu1  ;;  %v1161_v26 = vmax.f32 %v2488_v16, 0.0  ;;  %v1159_v15 = vpop.f32.mrb[3].mxu0 }
 0x1d9   :  { %v1967_v27 = vmax.f32 %v2490_v17, 0.0  ;;  %v1965_v28 = vpop.f32.mrb[3].mxu1  ;;  %v1162_v29 = vmax.f32 %v2489_v22, 0.0 }
 0x1da   :  { %v1968_v30 = vmax.f32 %v2491_v23, 0.0 }
 0x1db   :  { %v1969_v31 = vmax.f32 %v1161_v26, %v1967_v27 }
 0x1dc   :  { %v1970_v42 = vmax.f32 %v1162_v29, %v1968_v30 }
 0x1de   :  { %2436 = vmatprep.mubr.msk.f32.mxu0 %vm2006_vm0, %v1970_v42 }
 0x1df   :  { %2075 = vmatmul.mubr.f32.vlgmr.msra.gmra.mrb[4].mxu0 %v1969_v31 }
 0x2b2   :  { %v2076_v20 = vpop.f32.mrb[4].mxu0 }
 0x2b3   :  { %v2077_v33 = vadd.f32 %v2435_v32, %v2076_v20  ;;  %v2078_v21 = vpop.f32.mrb[5].mxu0 }
 0x2b5   :  { %v2080_v34 = vmax.f32 %v2077_v33, 0.0 }
 0x2b7   :  { %2444 = vmatmul.mubr.msk.f32.vlgmr.msra.gmra.mrb[4].mxu1 %vm2089_vm2, %v2080_v34 }
 0x38a   :  { %v2159_v36 = vpop.f32.mrb[4].mxu1 }
 0x38b   :  { %v2160_v37 = vadd.f32 %v2437_v35, %v2159_v36  ;;  %v2445_v38 = vpop.f32.mrb[5].mxu1 }
 0x38d   :  { %2164 = vst.msk [vmem:[#allocation2] sm:$0x3] %vm2163_vm3, %v2160_v37 }
 0x38e   :  { %2917 = shalt.err (!%p2914_p4)
}
 0x38f   :  { %s2918_s29 = scalar_lea.hbm %s3912_s8, 32 }
 0x390   :  { %p2919_p5 = scmp.ne.s32.totalorder %s3912_s8, %s2918_s29  ;;  %p2922_p6 = scmp.lt.u32.totalorder %s2918_s29, %s3912_s8 }
 0x392   :  { %p2924_p7 = pnand %p2922_p6, %p2919_p5 }
 0x394   :  { %2927 = shalt.err (!%p2924_p7)
}
 0x395   :  { %2174 = dma.vmem_to_hbm [thread:$0]  %s2172_s26, 32, %s3912_s8, [#allocation3]  }
 0x396   :  { %2928 = dma.done.wait [#allocation3], 32  }
 0x397   :  { %2929 = vsyncadd [#allocation3], 4294967264 }
 0x398   :  { %2178 = vsyncpa [#allocation3], 1 }

</bundles_post_ra>
